<compile_context>
chip_gen: v6e
topology: v6e:2x2x1
jax: 0.10.0
libtpu: 0.0.40
codegen_flags: <defaults>
</compile_context>

<pallas_src>
import functools

import jax
import jax.numpy as jnp
from jax.experimental import pallas as pl
from jax.experimental.pallas import tpu as pltpu

# ----------------------------- configuration --------------------------------
TRAJ_LEN = 4                       # traj_length
IN_DIM_TRAJ = TRAJ_LEN * 3         # 12  (sstep feature dim)
IN_DIM_SCALE = 1                   # scale_method in ['TLN', 'TDN']
COND_DIM = 32                      # condition_dim
HIDDEN = 32                        # cvae hidden width
LATENT = 16                        # cvae latent_dim
Z_SCALE = 1.0                      # stored but only used at inference time

# packed-input lane layout
SSTEP_OFF = 0
SCALE_OFF = SSTEP_OFF + IN_DIM_TRAJ          # 12
COND_OFF = SCALE_OFF + IN_DIM_SCALE          # 13
EPS_OFF = COND_OFF + COND_DIM                # 45
ONES_OFF = EPS_OFF + LATENT                  # 61 (bias lane)
PACK_W = 64                                  # padded packed input width
HEAD_W = 16                                  # decoder head width (12 step | 1 scale | pad)
MAX_TN = 1024                                # row-tile cap (safe for v7x VMEM)


# ------------------------------ Pallas kernel --------------------------------
def cvae_kernel(x_ref, w_in_ref, w_lat_ref, b_lat_ref, w_dz_ref, w_out_ref,
                b_out_ref, pred_ref, loss_ref, *, n_valid, tn):
    f32 = jnp.float32
    x = x_ref[...]                                        # (tn, 64)
    sstep = x[:, SSTEP_OFF:SSTEP_OFF + IN_DIM_TRAJ]       # (tn, 12)
    scale = x[:, SCALE_OFF:SCALE_OFF + IN_DIM_SCALE]      # (tn, 1)
    eps = x[:, EPS_OFF:EPS_OFF + LATENT]                  # (tn, 16)

    # Fused encoder first layer + decoder conditional partial (biases folded in
    # through the ones lane of the packed input): a single K=64 MXU push.
    h_both = jnp.dot(x, w_in_ref[...], preferred_element_type=f32)   # (tn, 64)
    h_enc = jnp.maximum(h_both[:, :HIDDEN], 0.0)
    hd_cond = h_both[:, HIDDEN:2 * HIDDEN]                # pre-activation c-part

    # Fused mu | logvar heads.
    lat = jnp.dot(h_enc, w_lat_ref[...], preferred_element_type=f32) + b_lat_ref[...]
    mu = lat[:, :LATENT]
    logvar = lat[:, LATENT:2 * LATENT]

    # Reparameterization — single EUP exp, reused below as std*std = exp(logvar).
    std = jnp.exp(0.5 * logvar)
    z = mu + std * eps

    # Decoder hidden.
    hd = jnp.maximum(
        jnp.dot(z, w_dz_ref[...], preferred_element_type=f32) + hd_cond, 0.0)

    # Fused step | scale heads.
    head = jnp.dot(hd, w_out_ref[...], preferred_element_type=f32) + b_out_ref[...]
    pred_step = head[:, :IN_DIM_TRAJ]                     # (tn, 12)
    pred_scale = head[:, IN_DIM_TRAJ:IN_DIM_TRAJ + 1]     # (tn, 1)

    # _generate_trajectory ('TLN'/'TDN'): pred_traj = pred_step * pred_scale.
    pred_ref[...] = pred_step * pred_scale

    # Masked per-block partial loss sums (global mean is taken in the wrapper).
    row0 = pl.program_id(0) * tn
    rid = row0 + jax.lax.broadcasted_iota(jnp.int32, (tn, 1), 0)
    mask = (rid < n_valid).astype(f32)

    sstep_sum = jnp.sum(mask * (pred_step - sstep) ** 2)
    scale_sum = jnp.sum(mask * (pred_scale - scale) ** 2)
    kld_row = -0.5 * jnp.sum(1.0 + logvar - mu * mu - std * std,
                             axis=-1, keepdims=True)
    kld_sum = jnp.sum(mask * kld_row)

    lane = jax.lax.broadcasted_iota(jnp.int32, (1, 8, 128), 2)
    loss_ref[...] = jnp.where(
        lane == 0, sstep_sum,
        jnp.where(lane == 1, scale_sum,
                  jnp.where(lane == 2, kld_sum, 0.0)))


# ------------------------------ parameters -----------------------------------
RAW_PARAM_SHAPES = {
    "enc_w1_sstep": (IN_DIM_TRAJ, HIDDEN),
    "enc_w1_scale": (IN_DIM_SCALE, HIDDEN),
    "enc_w1_cond": (COND_DIM, HIDDEN),
    "enc_b1": (1, HIDDEN),
    "enc_w_mu": (HIDDEN, LATENT),
    "enc_b_mu": (1, LATENT),
    "enc_w_lv": (HIDDEN, LATENT),
    "enc_b_lv": (1, LATENT),
    "dec_w1_z": (LATENT, HIDDEN),
    "dec_w1_cond": (COND_DIM, HIDDEN),
    "dec_b1": (1, HIDDEN),
    "dec_w_step": (HIDDEN, IN_DIM_TRAJ),
    "dec_b_step": (1, IN_DIM_TRAJ),
    "dec_w_scale": (HIDDEN, 1),
    "dec_b_scale": (1, 1),
}


def init_params(key):
    params = {}
    keys = jax.random.split(key, len(RAW_PARAM_SHAPES))
    for k, (name, shp) in zip(keys, RAW_PARAM_SHAPES.items()):
        if name.startswith(("enc_b", "dec_b")):
            params[name] = 0.05 * jax.random.normal(k, shp, jnp.float32)
        else:
            params[name] = 0.1 * jax.random.normal(k, shp, jnp.float32)
    return params


def pack_params(p):
    """One-time wrapper-side weight packing (fuses concat matmuls & biases)."""
    f32 = jnp.float32
    w_in = jnp.zeros((PACK_W, 2 * HIDDEN), f32)
    # encoder first layer  (output columns 0:HIDDEN)
    w_in = w_in.at[SSTEP_OFF:SSTEP_OFF + IN_DIM_TRAJ, :HIDDEN].set(p["enc_w1_sstep"])
    w_in = w_in.at[SCALE_OFF, :HIDDEN].set(p["enc_w1_scale"][0])
    w_in = w_in.at[COND_OFF:COND_OFF + COND_DIM, :HIDDEN].set(p["enc_w1_cond"])
    w_in = w_in.at[ONES_OFF, :HIDDEN].set(p["enc_b1"][0])
    # decoder conditional partial (output columns HIDDEN:2*HIDDEN)
    w_in = w_in.at[COND_OFF:COND_OFF + COND_DIM, HIDDEN:].set(p["dec_w1_cond"])
    w_in = w_in.at[ONES_OFF, HIDDEN:].set(p["dec_b1"][0])

    w_lat = jnp.concatenate([p["enc_w_mu"], p["enc_w_lv"]], axis=-1)   # (32, 32)
    b_lat = jnp.concatenate([p["enc_b_mu"], p["enc_b_lv"]], axis=-1)   # (1, 32)

    w_out = jnp.zeros((HIDDEN, HEAD_W), f32)
    w_out = w_out.at[:, :IN_DIM_TRAJ].set(p["dec_w_step"])
    w_out = w_out.at[:, IN_DIM_TRAJ].set(p["dec_w_scale"][:, 0])
    b_out = jnp.zeros((1, HEAD_W), f32)
    b_out = b_out.at[:, :IN_DIM_TRAJ].set(p["dec_b_step"])
    b_out = b_out.at[0, IN_DIM_TRAJ].set(p["dec_b_scale"][0, 0])

    return {"w_in": w_in, "w_lat": w_lat, "b_lat": b_lat,
            "w_dz": p["dec_w1_z"], "w_out": w_out, "b_out": b_out}


# --------------------------------- wrapper -----------------------------------
def _round_up(x, m):
    return (x + m - 1) // m * m


@jax.jit
def scale_traj_cvae_forward(context, sstep, scale, eps, packed_params):
    """Mirrors ScaleTrajCVAE.forward(context, target, pack, return_pred=True).

    context: (n_b, n_q, COND_DIM)   sstep: (n_b, n_q, IN_DIM_TRAJ)
    scale:   (n_b, n_q, 1)          eps:   (n_b, n_q, LATENT)
    returns (pred_traj (n_b,n_q,T,3), sstep_loss, scale_loss, KLD)
    """
    n_b, n_q, _ = context.shape
    n = n_b * n_q

    # Pack all per-row data into one lane-contiguous (n, 64) slab.
    x = jnp.concatenate(
        [
            sstep.reshape(n, IN_DIM_TRAJ).astype(jnp.float32),
            scale.reshape(n, IN_DIM_SCALE).astype(jnp.float32),
            context.reshape(n, COND_DIM).astype(jnp.float32),
            eps.reshape(n, LATENT).astype(jnp.float32),
            jnp.ones((n, 1), jnp.float32),                        # bias lane
            jnp.zeros((n, PACK_W - ONES_OFF - 1), jnp.float32),   # pad to 64
        ],
        axis=-1,
    )

    tn = min(MAX_TN, _round_up(n, 8))
    n_pad = _round_up(n, tn)
    if n_pad > n:
        x = jnp.concatenate(
            [x, jnp.zeros((n_pad - n, PACK_W), jnp.float32)], axis=0)
    grid = (n_pad // tn,)

    param_names = ("w_in", "w_lat", "b_lat", "w_dz", "w_out", "b_out")
    param_arrays = [packed_params[k] for k in param_names]
    param_specs = [pl.BlockSpec(p.shape, lambda i: (0, 0)) for p in param_arrays]

    kernel = functools.partial(cvae_kernel, n_valid=n, tn=tn)

    pred_flat, losses = pl.pallas_call(
        kernel,
        grid=grid,
        out_shape=(
            jax.ShapeDtypeStruct((n_pad, IN_DIM_TRAJ), jnp.float32),
            jax.ShapeDtypeStruct((grid[0], 8, 128), jnp.float32),
        ),
        in_specs=[pl.BlockSpec((tn, PACK_W), lambda i: (i, 0))] + param_specs,
        out_specs=(
            pl.BlockSpec((tn, IN_DIM_TRAJ), lambda i: (i, 0)),
            pl.BlockSpec((1, 8, 128), lambda i: (i, 0, 0)),
        ),
        compiler_params=pltpu.CompilerParams(
            dimension_semantics=("parallel",),
        ),
    )(x, *param_arrays)

    pred_traj = pred_flat[:n].reshape(n_b, n_q, TRAJ_LEN, 3)
    sums = jnp.sum(losses[:, 0, :3], axis=0)
    sstep_loss = sums[0] / (n * IN_DIM_TRAJ)
    scale_loss = sums[1] / (n * IN_DIM_SCALE)
    kld = sums[2] / n
    return pred_traj, sstep_loss, scale_loss, kld


# --------------------------- pure-JAX reference -------------------------------
def reference_forward(context, sstep, scale, eps, p):
    n_b, n_q, _ = context.shape
    n = n_b * n_q
    s = sstep.reshape(n, -1)
    sc = scale.reshape(n, -1)
    c = context.reshape(n, -1)
    e = eps.reshape(n, -1)
    h = jax.nn.relu(s @ p["enc_w1_sstep"] + sc @ p["enc_w1_scale"]
                    + c @ p["enc_w1_cond"] + p["enc_b1"])
    mu = h @ p["enc_w_mu"] + p["enc_b_mu"]
    lv = h @ p["enc_w_lv"] + p["enc_b_lv"]
    z = mu + jnp.exp(0.5 * lv) * e
    hd = jax.nn.relu(z @ p["dec_w1_z"] + c @ p["dec_w1_cond"] + p["dec_b1"])
    ps = hd @ p["dec_w_step"] + p["dec_b_step"]
    psc = hd @ p["dec_w_scale"] + p["dec_b_scale"]
    sstep_loss = jnp.mean((ps - s) ** 2)
    scale_loss = jnp.mean((psc - sc) ** 2)
    kld = jnp.mean(-0.5 * jnp.sum(1.0 + lv - mu * mu - jnp.exp(lv), axis=-1))
    pred = (ps * psc).reshape(n_b, n_q, TRAJ_LEN, 3)
    return pred, sstep_loss, scale_loss, kld


# ----------------------------------- main ------------------------------------
if __name__ == "__main__":
    key = jax.random.PRNGKey(0)
    k_ctx, k_sstep, k_scale, k_eps, k_params = jax.random.split(key, 5)

    n_b, n_q = 2, 8
    context = jax.random.normal(k_ctx, (n_b, n_q, COND_DIM), jnp.float32)
    # pack['ScaleTraj_sstep'] / pack['ScaleTraj_scale'] (target pre-split, since
    # _split_trajectory unconditionally raises in the reference module)
    pack_sstep = jax.random.normal(k_sstep, (n_b, n_q, IN_DIM_TRAJ), jnp.float32)
    pack_scale = jnp.abs(jax.random.normal(k_scale, (n_b, n_q, IN_DIM_SCALE),
                                           jnp.float32)) + 0.5
    eps = jax.random.normal(k_eps, (n_b, n_q, LATENT), jnp.float32)

    raw_params = init_params(k_params)
    packed_params = pack_params(raw_params)   # one-time wrapper-side packing

    pred_traj, sstep_loss, scale_loss, kld = scale_traj_cvae_forward(
        context, pack_sstep, pack_scale, eps, packed_params)
    jax.block_until_ready((pred_traj, sstep_loss, scale_loss, kld))

    assert pred_traj.shape == (n_b, n_q, TRAJ_LEN, 3)
    assert sstep_loss.shape == () and scale_loss.shape == () and kld.shape == ()

    # Lightweight correctness check against a pure-JAX reference.
    ref_pred, ref_sl, ref_scl, ref_kld = reference_forward(
        context, pack_sstep, pack_scale, eps, raw_params)
    tol = 5e-2
    assert float(jnp.max(jnp.abs(pred_traj - ref_pred))) < tol
    assert abs(float(sstep_loss - ref_sl)) < tol
    assert abs(float(scale_loss - ref_scl)) < tol
    assert abs(float(kld - ref_kld)) < tol

    # TODO(synk): ScaleTrajCVAE.inference() (single randn z repeat_interleave'd
    # across queries) is not implemented; only the training forward with
    # return_pred=True is covered.
    print("KERNEL_OK")
</pallas_src>

<mosaic_0001>
module attributes {stable_mosaic.version = 11 : i64} {
  func.func @cvae_kernel(%arg0: i32, %arg1: memref<16x64xf32, #tpu.memory_space<vmem>>, %arg2: memref<64x64xf32, #tpu.memory_space<vmem>>, %arg3: memref<32x32xf32, #tpu.memory_space<vmem>>, %arg4: memref<1x32xf32, #tpu.memory_space<vmem>>, %arg5: memref<16x32xf32, #tpu.memory_space<vmem>>, %arg6: memref<32x16xf32, #tpu.memory_space<vmem>>, %arg7: memref<1x16xf32, #tpu.memory_space<vmem>>, %arg8: memref<16x12xf32, #tpu.memory_space<vmem>>, %arg9: memref<1x8x128xf32, #tpu.memory_space<vmem>>) attributes {dimension_semantics = [#tpu.dimension_semantics<parallel>], iteration_bounds = array<i64: 1>, scalar_prefetch = 0 : i64, scratch_operands = 0 : i64, tpu.core_type = #tpu.core_type<tc>, window_params = [{transform_indices = @transform_0, window_bounds = array<i64: 16, 64>}, {pipeline_mode = #tpu.pipeline_mode<synchronous>, transform_indices = @transform_1, window_bounds = array<i64: 64, 64>}, {pipeline_mode = #tpu.pipeline_mode<synchronous>, transform_indices = @transform_2, window_bounds = array<i64: 32, 32>}, {pipeline_mode = #tpu.pipeline_mode<synchronous>, transform_indices = @transform_3, window_bounds = array<i64: 1, 32>}, {pipeline_mode = #tpu.pipeline_mode<synchronous>, transform_indices = @transform_4, window_bounds = array<i64: 16, 32>}, {pipeline_mode = #tpu.pipeline_mode<synchronous>, transform_indices = @transform_5, window_bounds = array<i64: 32, 16>}, {pipeline_mode = #tpu.pipeline_mode<synchronous>, transform_indices = @transform_6, window_bounds = array<i64: 1, 16>}, {transform_indices = @transform_7, window_bounds = array<i64: 16, 12>}, {transform_indices = @transform_8, window_bounds = array<i64: 1, 8, 128>}]} {
    %c0 = arith.constant 0 : index
    %c0_0 = arith.constant 0 : index
    %0 = vector.load %arg1[%c0, %c0_0] : memref<16x64xf32, #tpu.memory_space<vmem>>, vector<16x64xf32>
    %1 = vector.extract_strided_slice %0 {offsets = [0, 0], sizes = [16, 12], strides = [1, 1]} : vector<16x64xf32> to vector<16x12xf32>
    %2 = vector.extract_strided_slice %0 {offsets = [0, 12], sizes = [16, 1], strides = [1, 1]} : vector<16x64xf32> to vector<16x1xf32>
    %3 = vector.extract_strided_slice %0 {offsets = [0, 45], sizes = [16, 16], strides = [1, 1]} : vector<16x64xf32> to vector<16x16xf32>
    %c0_1 = arith.constant 0 : index
    %c0_2 = arith.constant 0 : index
    %4 = vector.load %arg2[%c0_1, %c0_2] : memref<64x64xf32, #tpu.memory_space<vmem>>, vector<64x64xf32>
    %cst = arith.constant dense<0.000000e+00> : vector<16x64xf32>
    %5 = tpu.matmul %0, %4, %cst {dimension_numbers = #tpu.dot_dimension_numbers<[1], [0], [0], [1], [0, 0, 1, 1], [], []>} : vector<16x64xf32>, vector<64x64xf32>, vector<16x64xf32> -> vector<16x64xf32>
    %6 = vector.extract_strided_slice %5 {offsets = [0, 0], sizes = [16, 32], strides = [1, 1]} : vector<16x64xf32> to vector<16x32xf32>
    %cst_3 = arith.constant 0.000000e+00 : f32
    %7 = vector.broadcast %cst_3 : f32 to vector<16x32xf32>
    %8 = arith.maximumf %6, %7 : vector<16x32xf32>
    %9 = vector.extract_strided_slice %5 {offsets = [0, 32], sizes = [16, 32], strides = [1, 1]} : vector<16x64xf32> to vector<16x32xf32>
    %c0_4 = arith.constant 0 : index
    %c0_5 = arith.constant 0 : index
    %10 = vector.load %arg3[%c0_4, %c0_5] : memref<32x32xf32, #tpu.memory_space<vmem>>, vector<32x32xf32>
    %cst_6 = arith.constant dense<0.000000e+00> : vector<16x32xf32>
    %11 = tpu.matmul %8, %10, %cst_6 {dimension_numbers = #tpu.dot_dimension_numbers<[1], [0], [0], [1], [0, 0, 1, 1], [], []>} : vector<16x32xf32>, vector<32x32xf32>, vector<16x32xf32> -> vector<16x32xf32>
    %c0_7 = arith.constant 0 : index
    %c0_8 = arith.constant 0 : index
    %12 = vector.load %arg4[%c0_7, %c0_8] : memref<1x32xf32, #tpu.memory_space<vmem>>, vector<1x32xf32>
    %13 = vector.broadcast %12 : vector<1x32xf32> to vector<16x32xf32>
    %14 = arith.addf %11, %13 : vector<16x32xf32>
    %15 = vector.extract_strided_slice %14 {offsets = [0, 0], sizes = [16, 16], strides = [1, 1]} : vector<16x32xf32> to vector<16x16xf32>
    %16 = vector.extract_strided_slice %14 {offsets = [0, 16], sizes = [16, 16], strides = [1, 1]} : vector<16x32xf32> to vector<16x16xf32>
    %cst_9 = arith.constant 5.000000e-01 : f32
    %17 = vector.broadcast %cst_9 : f32 to vector<16x16xf32>
    %18 = arith.mulf %17, %16 : vector<16x16xf32>
    %19 = math.exp %18 : vector<16x16xf32>
    %20 = arith.mulf %19, %3 : vector<16x16xf32>
    %21 = arith.addf %15, %20 : vector<16x16xf32>
    %c0_10 = arith.constant 0 : index
    %c0_11 = arith.constant 0 : index
    %22 = vector.load %arg5[%c0_10, %c0_11] : memref<16x32xf32, #tpu.memory_space<vmem>>, vector<16x32xf32>
    %cst_12 = arith.constant dense<0.000000e+00> : vector<16x32xf32>
    %23 = tpu.matmul %21, %22, %cst_12 {dimension_numbers = #tpu.dot_dimension_numbers<[1], [0], [0], [1], [0, 0, 1, 1], [], []>} : vector<16x16xf32>, vector<16x32xf32>, vector<16x32xf32> -> vector<16x32xf32>
    %24 = arith.addf %23, %9 : vector<16x32xf32>
    %cst_13 = arith.constant 0.000000e+00 : f32
    %25 = vector.broadcast %cst_13 : f32 to vector<16x32xf32>
    %26 = arith.maximumf %24, %25 : vector<16x32xf32>
    %c0_14 = arith.constant 0 : index
    %c0_15 = arith.constant 0 : index
    %27 = vector.load %arg6[%c0_14, %c0_15] : memref<32x16xf32, #tpu.memory_space<vmem>>, vector<32x16xf32>
    %cst_16 = arith.constant dense<0.000000e+00> : vector<16x16xf32>
    %28 = tpu.matmul %26, %27, %cst_16 {dimension_numbers = #tpu.dot_dimension_numbers<[1], [0], [0], [1], [0, 0, 1, 1], [], []>} : vector<16x32xf32>, vector<32x16xf32>, vector<16x16xf32> -> vector<16x16xf32>
    %c0_17 = arith.constant 0 : index
    %c0_18 = arith.constant 0 : index
    %29 = vector.load %arg7[%c0_17, %c0_18] : memref<1x16xf32, #tpu.memory_space<vmem>>, vector<1x16xf32>
    %30 = vector.broadcast %29 : vector<1x16xf32> to vector<16x16xf32>
    %31 = arith.addf %28, %30 : vector<16x16xf32>
    %32 = vector.extract_strided_slice %31 {offsets = [0, 0], sizes = [16, 12], strides = [1, 1]} : vector<16x16xf32> to vector<16x12xf32>
    %33 = vector.extract_strided_slice %31 {offsets = [0, 12], sizes = [16, 1], strides = [1, 1]} : vector<16x16xf32> to vector<16x1xf32>
    %34 = vector.broadcast %33 : vector<16x1xf32> to vector<16x12xf32>
    %35 = arith.mulf %32, %34 : vector<16x12xf32>
    %c0_19 = arith.constant 0 : index
    %c0_20 = arith.constant 0 : index
    %36 = vector.load %arg8[%c0_19, %c0_20] : memref<16x12xf32, #tpu.memory_space<vmem>>, vector<16x12xf32>
    tpu.vector_store %arg8[%c0_19, %c0_20], %35 {strides = array<i32>} : memref<16x12xf32, #tpu.memory_space<vmem>>, vector<16x12xf32>,
    %c16_i32 = arith.constant 16 : i32
    %37 = arith.muli %arg0, %c16_i32 : i32
    %38 = tpu.iota {dimensions = array<i32: 0>} : vector<16x1xi32>
    %39 = vector.broadcast %37 : i32 to vector<16x1xi32>
    %40 = arith.addi %39, %38 : vector<16x1xi32>
    %c16_i32_21 = arith.constant 16 : i32
    %41 = vector.broadcast %c16_i32_21 : i32 to vector<16x1xi32>
    %42 = arith.cmpi slt, %40, %41 : vector<16x1xi32>
    %43 = arith.extui %42 : vector<16x1xi1> to vector<16x1xi32>
    %44 = arith.sitofp %43 : vector<16x1xi32> to vector<16x1xf32>
    %45 = arith.subf %32, %1 : vector<16x12xf32>
    %46 = arith.mulf %45, %45 : vector<16x12xf32>
    %47 = vector.broadcast %44 : vector<16x1xf32> to vector<16x12xf32>
    %48 = arith.mulf %47, %46 : vector<16x12xf32>
    %49 = vector.shape_cast %48 : vector<16x12xf32> to vector<1x16x12xf32>
    %cst_22 = arith.constant dense<0.000000e+00> : vector<1xf32>
    %50 = vector.multi_reduction <add>, %49, %cst_22 [1, 2] : vector<1x16x12xf32> to vector<1xf32>
    %51 = vector.shape_cast %50 : vector<1xf32> to vector<1x1x1xf32>
    %52 = vector.extract %51[0, 0, 0] : f32 from vector<1x1x1xf32>
    %53 = arith.subf %33, %2 : vector<16x1xf32>
    %54 = arith.mulf %53, %53 : vector<16x1xf32>
    %55 = arith.mulf %44, %54 : vector<16x1xf32>
    %56 = vector.shape_cast %55 : vector<16x1xf32> to vector<1x16x1xf32>
    %cst_23 = arith.constant dense<0.000000e+00> : vector<1xf32>
    %57 = vector.multi_reduction <add>, %56, %cst_23 [1, 2] : vector<1x16x1xf32> to vector<1xf32>
    %58 = vector.shape_cast %57 : vector<1xf32> to vector<1x1x1xf32>
    %59 = vector.extract %58[0, 0, 0] : f32 from vector<1x1x1xf32>
    %cst_24 = arith.constant 1.000000e+00 : f32
    %60 = vector.broadcast %cst_24 : f32 to vector<16x16xf32>
    %61 = arith.addf %60, %16 : vector<16x16xf32>
    %62 = arith.mulf %15, %15 : vector<16x16xf32>
    %63 = arith.subf %61, %62 : vector<16x16xf32>
    %64 = arith.mulf %19, %19 : vector<16x16xf32>
    %65 = arith.subf %63, %64 : vector<16x16xf32>
    %cst_25 = arith.constant dense<0.000000e+00> : vector<16xf32>
    %66 = vector.multi_reduction <add>, %65, %cst_25 [1] : vector<16x16xf32> to vector<16xf32>
    %67 = vector.shape_cast %66 : vector<16xf32> to vector<16x1xf32>
    %cst_26 = arith.constant -5.000000e-01 : f32
    %68 = vector.broadcast %cst_26 : f32 to vector<16x1xf32>
    %69 = arith.mulf %68, %67 : vector<16x1xf32>
    %70 = arith.mulf %44, %69 : vector<16x1xf32>
    %71 = vector.shape_cast %70 : vector<16x1xf32> to vector<1x16x1xf32>
    %cst_27 = arith.constant dense<0.000000e+00> : vector<1xf32>
    %72 = vector.multi_reduction <add>, %71, %cst_27 [1, 2] : vector<1x16x1xf32> to vector<1xf32>
    %73 = vector.shape_cast %72 : vector<1xf32> to vector<1x1x1xf32>
    %74 = vector.extract %73[0, 0, 0] : f32 from vector<1x1x1xf32>
    %75 = tpu.iota {dimensions = array<i32: 2>} : vector<1x8x128xi32>
    %c0_i32 = arith.constant 0 : i32
    %76 = vector.broadcast %c0_i32 : i32 to vector<1x8x128xi32>
    %77 = arith.cmpi eq, %75, %76 : vector<1x8x128xi32>
    %c1_i32 = arith.constant 1 : i32
    %78 = vector.broadcast %c1_i32 : i32 to vector<1x8x128xi32>
    %79 = arith.cmpi eq, %75, %78 : vector<1x8x128xi32>
    %c2_i32 = arith.constant 2 : i32
    %80 = vector.broadcast %c2_i32 : i32 to vector<1x8x128xi32>
    %81 = arith.cmpi eq, %75, %80 : vector<1x8x128xi32>
    %cst_28 = arith.constant 0.000000e+00 : f32
    %82 = vector.broadcast %74 : f32 to vector<1x8x128xf32>
    %83 = vector.broadcast %cst_28 : f32 to vector<1x8x128xf32>
    %84 = arith.select %81, %82, %83 : vector<1x8x128xi1>, vector<1x8x128xf32>
    %85 = vector.broadcast %59 : f32 to vector<1x8x128xf32>
    %86 = arith.select %79, %85, %84 : vector<1x8x128xi1>, vector<1x8x128xf32>
    %87 = vector.broadcast %52 : f32 to vector<1x8x128xf32>
    %88 = arith.select %77, %87, %86 : vector<1x8x128xi1>, vector<1x8x128xf32>
    %c0_29 = arith.constant 0 : index
    %c0_30 = arith.constant 0 : index
    %c0_31 = arith.constant 0 : index
    %89 = vector.load %arg9[%c0_29, %c0_30, %c0_31] : memref<1x8x128xf32, #tpu.memory_space<vmem>>, vector<1x8x128xf32>
    tpu.vector_store %arg9[%c0_29, %c0_30, %c0_31], %88 {strides = array<i32>} : memref<1x8x128xf32, #tpu.memory_space<vmem>>, vector<1x8x128xf32>,
    return
  }
  func.func @transform_0(%arg0: i32) -> (i32, i32) {
    %c0_i32 = arith.constant 0 : i32
    %c0_i32_0 = arith.constant 0 : i32
    return %arg0, %c0_i32 : i32, i32
  }
  func.func @transform_1(%arg0: i32) -> (i32, i32) {
    %c0_i32 = arith.constant 0 : i32
    %c0_i32_0 = arith.constant 0 : i32
    %c0_i32_1 = arith.constant 0 : i32
    return %c0_i32, %c0_i32_0 : i32, i32
  }
  func.func @transform_2(%arg0: i32) -> (i32, i32) {
    %c0_i32 = arith.constant 0 : i32
    %c0_i32_0 = arith.constant 0 : i32
    %c0_i32_1 = arith.constant 0 : i32
    return %c0_i32, %c0_i32_0 : i32, i32
  }
  func.func @transform_3(%arg0: i32) -> (i32, i32) {
    %c0_i32 = arith.constant 0 : i32
    %c0_i32_0 = arith.constant 0 : i32
    %c0_i32_1 = arith.constant 0 : i32
    return %c0_i32, %c0_i32_0 : i32, i32
  }
  func.func @transform_4(%arg0: i32) -> (i32, i32) {
    %c0_i32 = arith.constant 0 : i32
    %c0_i32_0 = arith.constant 0 : i32
    %c0_i32_1 = arith.constant 0 : i32
    return %c0_i32, %c0_i32_0 : i32, i32
  }
  func.func @transform_5(%arg0: i32) -> (i32, i32) {
    %c0_i32 = arith.constant 0 : i32
    %c0_i32_0 = arith.constant 0 : i32
    %c0_i32_1 = arith.constant 0 : i32
    return %c0_i32, %c0_i32_0 : i32, i32
  }
  func.func @transform_6(%arg0: i32) -> (i32, i32) {
    %c0_i32 = arith.constant 0 : i32
    %c0_i32_0 = arith.constant 0 : i32
    %c0_i32_1 = arith.constant 0 : i32
    return %c0_i32, %c0_i32_0 : i32, i32
  }
  func.func @transform_7(%arg0: i32) -> (i32, i32) {
    %c0_i32 = arith.constant 0 : i32
    %c0_i32_0 = arith.constant 0 : i32
    return %arg0, %c0_i32 : i32, i32
  }
  func.func @transform_8(%arg0: i32) -> (i32, i32, i32) {
    %c0_i32 = arith.constant 0 : i32
    %c0_i32_0 = arith.constant 0 : i32
    %c0_i32_1 = arith.constant 0 : i32
    return %arg0, %c0_i32, %c0_i32_0 : i32, i32, i32
  }
}

</mosaic_0001>

<bundles_post_ra>
// kernel: scale_traj_cvae_forward.1
= control target key start
LH: loop header
LB: loop body
LE: loop exit
PB: predicated region body
PF: predicated region fallthrough
CT: control target
= control target key end

     0   :  { %vm38_vm0 = vcmask 523264   ;;  %s662_s17 = smov 99   ;;  %vm133_vm1 = vcmask 261120   ;;  %s663_s10 = smov 96   ;;  %vm249_vm2 = vcmask 130048   ;;  %vm437_vm3 = vcmask 97280   ;;  %s814_s1 = inlined_call_operand.vmem [shape: f32[64,64], index: 1, kind: input, shape index: {}]   ;;  %s815_s0 = inlined_call_operand.vmem [shape: f32[16,64], index: 0, kind: input, shape index: {}]   ;;  %s816_s2 = inlined_call_operand.vmem [shape: f32[32,32], index: 2, kind: input, shape index: {}]   ;;  %s817_s3 = inlined_call_operand.vmem [shape: f32[1,32], index: 3, kind: input, shape index: {}]   ;;  %s818_s4 = inlined_call_operand.vmem [shape: f32[16,32], index: 4, kind: input, shape index: {}]   ;;  %s819_s5 = inlined_call_operand.vmem [shape: f32[32,16], index: 5, kind: input, shape index: {}]   ;;  %s820_s6 = inlined_call_operand.vmem [shape: f32[1,16], index: 6, kind: input, shape index: {}]   ;;  %s821_s7 = inlined_call_operand.vmem [shape: f32[16,12], index: 7, kind: output, shape index: {0}]   ;;  %s822_s8 = inlined_call_operand.vmem [shape: f32[1,8,128], index: 8, kind: output, shape index: {1}]  }
   0x1   :  { %v37_v0 = vld [vmem:[%s814_s1 + $0x38] sm:$0xff]  ;;  %v36_v1 = vld [vmem:[%s814_s1 + $0x30] sm:$0xff]  ;;  %v35_v2 = vld [vmem:[%s814_s1 + $0x28] sm:$0xff]  ;;  %s665_s16 = smov 112   ;;  %s667_s25 = smov 116   ;;  %vm479_vm4 = vcmask 7168  }
   0x2   :  { %596 = vmatprep.subr.mxu0 %v37_v0  ;;  %v725_v3 = vld [vmem:[%s815_s0] sm:$0xff]  ;;  %v125_v4 = vld [vmem:[%s816_s2 + $0x18] sm:$0xff]  ;;  %v742_v7 = vld [vmem:[%s815_s0 + $0x8] sm:$0xff] }
   0x3   :  { %597 = vmatpush3.msra.mxu0 %v37_v0  ;;  %612 = vmatprep.mubr.msk.f32.mxu0 %vm38_vm0, %v725_v3  ;;  %v34_v5 = vld [vmem:[%s814_s1 + $0x20] sm:$0xff]  ;;  %v33_v6 = vld [vmem:[%s814_s1 + $0x18] sm:$0xff]  ;;  %v32_v8 = vld [vmem:[%s814_s1 + $0x10] sm:$0xff] }
   0x4   :  { %598 = vmatprep.subr.mxu0 %v36_v1  ;;  %221 = vrot.lane.b32.xlu0 %v725_v3, %s662_s17  ;;  %v31_v9 = vld [vmem:[%s814_s1 + $0x8] sm:$0xff]  ;;  %v30_v10 = vld [vmem:[%s814_s1] sm:$0xff]  ;;  %v124_v11 = vld [vmem:[%s816_s2 + $0x10] sm:$0xff] }
   0x5   :  { %599 = vmatpush3.msra.mxu0 %v36_v1  ;;  %615 = vmatprep.subr.mxu1 %v125_v4  ;;  %v123_v12 = vld [vmem:[%s816_s2 + $0x8] sm:$0xff]  ;;  %v122_v13 = vld [vmem:[%s816_s2] sm:$0xff]  ;;  %s664_s2 = smov 16   ;;  %v336_v53 = vld [vmem:[%s819_s5 + $0x18] sm:$0xff] }
   0x6   :  { %600 = vmatprep.subr.mxu0 %v35_v2  ;;  %616 = vmatpush3.msra.mxu1 %v125_v4  ;;  %v562_v18 = vld [vmem:[%s817_s3] ss:$0 sm:$0xff]  ;;  %v240_v28 = vld [vmem:[%s818_s4 + $0x8] sm:$0xff]  ;;  %v335_v54 = vld [vmem:[%s819_s5 + $0x10] sm:$0xff]  ;;  %v666_v4 = vmov 12  }
   0x7   :  { %601 = vmatpush3.msra.mxu0 %v35_v2  ;;  %617 = vmatprep.subr.mxu1 %v124_v11  ;;  %v239_v29 = vld [vmem:[%s818_s4] sm:$0xff]  ;;  %v334_v55 = vld [vmem:[%s819_s5 + $0x8] sm:$0xff] }
   0x8   :  { %602 = vmatprep.subr.mxu0 %v34_v5  ;;  %223 = vrot.lane.b32.xlu0 %v742_v7, %s662_s17  ;;  %v333_v56 = vld [vmem:[%s819_s5] sm:$0xff] }
   0x9   :  { %603 = vmatpush3.msra.mxu0 %v34_v5  ;;  %618 = vmatpush3.msra.mxu1 %v124_v11  ;;  %v567_v5 = vld [vmem:[%s820_s6] ss:$0 sm:$0xff] }
   0xa   :  { %604 = vmatprep.subr.mxu0 %v33_v6  ;;  %619 = vmatprep.subr.mxu1 %v123_v12 }
   0xb   :  { %605 = vmatpush3.msra.mxu0 %v33_v6  ;;  %620 = vmatpush3.msra.mxu1 %v123_v12 }
   0xc   :  { %606 = vmatprep.subr.mxu0 %v32_v8  ;;  %621 = vmatprep.subr.mxu1 %v122_v13 }
   0xd   :  { %607 = vmatpush3.msra.mxu0 %v32_v8  ;;  %622 = vmatpush3.msra.mxu1 %v122_v13 }
   0xe   :  { %608 = vmatprep.subr.mxu0 %v31_v9  ;;  %626 = vmatprep.subr.mxu1 %v240_v28 }
   0xf   :  { %609 = vmatpush3.msra.mxu0 %v31_v9  ;;  %656 = vset.pattern.permute.xlu0 %v666_v4 }
  0x10   :  { %610 = vmatprep.subr.mxu0 %v30_v10  ;;  %657 = vset.pattern.permute.xlu1 %v666_v4 }
  0x11   :  { %611 = vmatpush3.msra.mxu0 %v30_v10 }
  0x12   :  { %613 = vmatmul.mubr.msk.f32.vlgmr.msra.gmra.mxu0 %vm38_vm0, %v742_v7 }
  0x76   :  { %v222_v30 = vpop.permute.xlu0 %221 }
  0x7a   :  { %v224_v34 = vpop.permute.xlu0 %223 }
  0xd2   :  { %v614_v14 = vpop.f32.mrf.mxu0 }
  0xd3   :  { %v121_v17 = vmax.f32 %v614_v14, 0.0 }
  0xd4   :  { %v111_v15 = vpop.f32.mrf.mxu0 }
  0xd5   :  { %v120_v16 = vmax.f32 %v111_v15, 0.0  ;;  %243 = vrot.lane.b32.xlu0 %v111_v15, %s663_s10 }
  0xd7   :  { %623 = vmatprep.mubr.msk.f32.mxu1 %vm133_vm1, %v120_v16 }
  0xd8   :  { %624 = vmatmul.mubr.msk.f32.vlgmr.msra.gmra.mxu1 %vm133_vm1, %v121_v17 }
  0xd9   :  { %627 = vmatpush3.msra.mxu1 %v240_v28 }
  0xda   :  { %628 = vmatprep.subr.mxu1 %v239_v29 }
  0xdb   :  { %629 = vmatpush3.msra.mxu1 %v239_v29 }
  0xdc   :  { %633 = vmatprep.subr.mxu1 %v336_v53 }
 0x147   :  { %v244_v37 = vpop.permute.xlu0 %243 }
 0x198   :  { %v625_v19 = vpop.f32.mrf.mxu1 }
 0x199   :  { %v212_v20 = vadd.f32 %v625_v19, %v562_v18 }
 0x19a   :  { %v206_v21 = vpop.f32.mrf.mxu1 }
 0x19b   :  { %v216_v22 = vmul.f32 0.5, %v212_v20  ;;  %v207_v23 = vadd.f32 %v562_v18, %v206_v21  ;;  %v495_v36 = vmul.f32 %v212_v20, %v212_v20  ;;  %v493_v48 = vadd.f32 1.0, %v212_v20 }
 0x19d   :  { %v215_v24 = vmul.f32 0.5, %v207_v23  ;;  %v494_v25 = vmul.f32 %v207_v23, %v207_v23  ;;  %v219_v26 = vmul.f32 1.442695, %v216_v22  ;;  %v492_v38 = vadd.f32 1.0, %v207_v23 }
 0x19f   :  { %v217_v27 = vmul.f32 1.442695, %v215_v24  ;;  %498 = vrot.lane.b32.xlu0 %v494_v25, %s664_s2 }
 0x1a1   :  { %658 = vpow2.f32 %v217_v27 }
 0x1a2   :  { %660 = vpow2.f32 %v219_v26 }
 0x1ae   :  { %v659_v31 = vpop.eup %658 }
 0x1af   :  { %v227_v32 = vmul.f32 %v659_v31, %v222_v30  ;;  %v661_v33 = vpop.eup %660  ;;  %v506_v41 = vmul.f32 %v659_v31, %v659_v31 }
 0x1b0   :  { %v228_v35 = vmul.f32 %v661_v33, %v224_v34  ;;  %v507_v50 = vmul.f32 %v661_v33, %v661_v33 }
 0x1b1   :  { %231 = vrot.lane.b32.xlu1 %v227_v32, %s665_s16 }
 0x1b5   :  { %233 = vrot.lane.b32.xlu1 %v228_v35, %s665_s16 }
 0x1b9   :  { %245 = vrot.lane.b32.xlu1 %v614_v14, %s663_s10 }
 0x1bd   :  { %500 = vrot.lane.b32.xlu1 %v495_v36, %s664_s2 }
 0x211   :  { %v499_v39 = vpop.permute.xlu0 %498 }
 0x212   :  { %v504_v40 = vsub.f32 %v492_v38, %v499_v39 }
 0x214   :  { %v508_v42 = vsub.f32 %v504_v40, %v506_v41 }
 0x216   :  { %512 = vrot.lane.b32.xlu0 %v508_v42, %s665_s16 }
 0x223   :  { %v232_v43 = vpop.permute.xlu1 %231 }
 0x224   :  { %v237_v44 = vadd.f32 %v232_v43, %v207_v23 }
 0x226   :  { %630 = vmatprep.mubr.msk.f32.mxu1 %vm249_vm2, %v237_v44 }
 0x227   :  { %v234_v45 = vpop.permute.xlu1 %233 }
 0x228   :  { %v238_v46 = vadd.f32 %v234_v45, %v212_v20 }
 0x22a   :  { %631 = vmatmul.mubr.msk.f32.vlgmr.msra.gmra.mxu1 %vm249_vm2, %v238_v46 }
 0x22b   :  { %v246_v47 = vpop.permute.xlu1 %245  ;;  %634 = vmatpush3.msra.mxu1 %v336_v53  ;;  %v540_v53 = vlaneseq }
 0x22c   :  { %635 = vmatprep.subr.mxu1 %v335_v54 }
 0x22d   :  { %636 = vmatpush3.msra.mxu1 %v335_v54  ;;  %v541_v54 = vand.u32 127, %v540_v53 }
 0x22e   :  { %637 = vmatprep.subr.mxu1 %v334_v55 }
 0x22f   :  { %v501_v49 = vpop.permute.xlu1 %500  ;;  %638 = vmatpush3.msra.mxu1 %v334_v55  ;;  %vm544_vm5 = vcmp.eq.s32.totalorder %v541_v54, 2  ;;  %vm543_vm6 = vcmp.eq.s32.totalorder %v541_v54, 1  ;;  %vm542_vm7 = vcmp.eq.s32.totalorder %v541_v54, 0 }
 0x230   :  { %v505_v51 = vsub.f32 %v493_v48, %v501_v49  ;;  %639 = vmatprep.subr.mxu1 %v333_v56 }
 0x231   :  { %640 = vmatpush3.msra.mxu1 %v333_v56 }
 0x232   :  { %v509_v52 = vsub.f32 %v505_v51, %v507_v50 }
 0x234   :  { %514 = vrot.lane.b32.xlu1 %v509_v52, %s665_s16 }
 0x288   :  { %v513_v57 = vpop.permute.xlu0 %512 }
 0x289   :  { %v518_v58 = vsel %vm249_vm2, %v513_v57, 0.0 }
 0x28a   :  { %519 = vadd.xlane.f32.xlu0 %v518_v58 }
 0x2a6   :  { %v515_v59 = vpop.permute.xlu1 %514 }
 0x2a7   :  { %v521_v60 = vsel %vm249_vm2, %v515_v59, 0.0 }
 0x2a8   :  { %522 = vadd.xlane.f32.xlu1 %v521_v60 }
 0x2ea   :  { %v632_v61 = vpop.f32.mrf.mxu1 }
 0x2eb   :  { %v328_v62 = vadd.f32 %v632_v61, %v246_v47 }
 0x2ec   :  { %v322_v63 = vpop.f32.mrf.mxu1 }
 0x2ed   :  { %v323_v0 = vadd.f32 %v322_v63, %v244_v37  ;;  %v332_v2 = vmax.f32 %v328_v62, 0.0 }
 0x2ef   :  { %v331_v1 = vmax.f32 %v323_v0, 0.0 }
 0x2f1   :  { %641 = vmatprep.mubr.msk.f32.mxu1 %vm133_vm1, %v331_v1 }
 0x2f2   :  { %642 = vmatmul.mubr.msk.f32.vlgmr.msra.gmra.mxu1 %vm133_vm1, %v332_v2 }
 0x313   :  { %v520_v16 = vpop.xlane.xlu0 %519 }
 0x314   :  { %v524_v19 = vmul.f32 -0.5, %v520_v16 }
 0x331   :  { %v523_v15 = vpop.xlane.xlu1 %522 }
 0x332   :  { %v525_v17 = vmul.f32 -0.5, %v523_v15 }
 0x334   :  { %v529_v22 = vsel %vm479_vm4, %v525_v17, 0.0 }
 0x3b2   :  { %v643_v6 = vpop.f32.mrf.mxu1 }
 0x3b3   :  { %v422_v8 = vadd.f32 %v643_v6, %v567_v5 }
 0x3b4   :  { %v416_v9 = vpop.f32.mrf.mxu1 }
 0x3b5   :  { %v417_v10 = vadd.f32 %v567_v5, %v416_v9  ;;  %v454_v11 = vsub.f32 %v422_v8, %v742_v7  ;;  %v528_v7 = vsel %vm479_vm4, %v524_v19, 0.0 }
 0x3b6   :  { %v530_v23 = vadd.f32 %v529_v22, %v528_v7 }
 0x3b7   :  { %v456_v12 = vmul.f32 %v454_v11, %v454_v11  ;;  %v453_v13 = vsub.f32 %v417_v10, %v725_v3 }
 0x3b9   :  { %475 = vrot.lane.b32.xlu1 %v456_v12, %s667_s25  ;;  %v455_v14 = vmul.f32 %v453_v13, %v453_v13  ;;  %v460_v20 = vsel %vm437_vm3, %v456_v12, 0.0 }
 0x3bb   :  { %473 = vrot.lane.b32.xlu0 %v455_v14, %s667_s25  ;;  %v459_v18 = vsel %vm437_vm3, %v455_v14, 0.0 }
 0x3bc   :  { %v461_v21 = vadd.f32 %v460_v20, %v459_v18 }
 0x3da   :  { %462 = vadd.xlane.f32.xlu0 %v461_v21 }
 0x3de   :  { %531 = vadd.xlane.f32.xlu0 %v530_v23 }
 0x3f4   :  { %427 = vperm.xlu0 %656, %v417_v10  }
 0x42b   :  { %v476_v3 = vpop.permute.xlu1 %475 }
 0x42c   :  { %v481_v25 = vsel %vm479_vm4, %v476_v3, 0.0 }
 0x42d   :  { %v474_v24 = vpop.permute.xlu0 %473 }
 0x42e   :  { %v480_v26 = vsel %vm479_vm4, %v474_v24, 0.0 }
 0x42f   :  { %v482_v27 = vadd.f32 %v481_v25, %v480_v26 }
 0x431   :  { %483 = vadd.xlane.f32.xlu1 %v482_v27 }
 0x442   :  { %432 = vperm.xlu1 %657, %v422_v8  }
 0x463   :  { %v463_v28 = vpop.xlane.xlu0 %462 }
 0x464   :  { %v464_v29 = vrot.slane %v463_v28, 4 }
 0x466   :  { %v465_v30 = vadd.f32 %v464_v29, %v463_v28 }
 0x467   :  { %v532_v33 = vpop.xlane.xlu0 %531 }
 0x468   :  { %v466_v31 = vrot.slane %v465_v30, 2  ;;  %v533_v38 = vrot.slane %v532_v33, 4 }
 0x46a   :  { %v467_v32 = vadd.f32 %v466_v31, %v465_v30  ;;  %v534_v39 = vadd.f32 %v533_v38, %v532_v33 }
 0x46c   :  { %v468_v34 = vrot.slane %v467_v32, 1  ;;  %v535_v40 = vrot.slane %v534_v39, 2 }
 0x46e   :  { %v469_v35 = vadd.f32 %v468_v34, %v467_v32  ;;  %v536_v45 = vadd.f32 %v535_v40, %v534_v39 }
 0x46f   :  { %v428_v36 = vpop.permute.xlu0 %427 }
 0x470   :  { %v435_v37 = vmul.f32 %v428_v36, %v417_v10  ;;  %644 = vpush %v469_v35  ;;  %v537_v49 = vrot.slane %v536_v45, 1 }
 0x472   :  { %438 = vst.msk [vmem:[%s821_s7] sm:$0xff] %vm437_vm3, %v435_v37  ;;  %v538_v52 = vadd.f32 %v537_v49, %v536_v45 }
 0x4a1   :  { %s645_s28 = spop %644 }
 0x4a2   :  { %v549_v58 = vstv %s645_s28 }
 0x4ba   :  { %v484_v41 = vpop.xlane.xlu1 %483 }
 0x4bb   :  { %v485_v42 = vrot.slane %v484_v41, 4 }
 0x4bd   :  { %v486_v43 = vadd.f32 %v485_v42, %v484_v41 }
 0x4be   :  { %v433_v44 = vpop.permute.xlu1 %432 }
 0x4bf   :  { %v487_v46 = vrot.slane %v486_v43, 2  ;;  %v436_v47 = vmul.f32 %v433_v44, %v422_v8 }
 0x4c1   :  { %439 = vst.msk [vmem:[%s821_s7 + $0x8] sm:$0xff] %vm437_vm3, %v436_v47  ;;  %v488_v48 = vadd.f32 %v487_v46, %v486_v43 }
 0x4c3   :  { %v489_v50 = vrot.slane %v488_v48, 1 }
 0x4c5   :  { %v490_v51 = vadd.f32 %v489_v50, %v488_v48 }
 0x4c7   :  { %646 = vpush %v490_v51 }
 0x4c8   :  { %648 = vpush %v538_v52 }
 0x4f8   :  { %s647_s29 = spop %646 }
 0x4f9   :  { %v547_v55 = vstv %s647_s29  ;;  %s649_s30 = spop %648 }
 0x4fa   :  { %v545_v56 = vstv %s649_s30 }
 0x4fb   :  { %v546_v57 = vsel %vm544_vm5, %v545_v56, 0.0 }
 0x4fc   :  { %v548_v59 = vsel %vm543_vm6, %v547_v55, %v546_v57 }
 0x4fd   :  { %v550_v60 = vsel %vm542_vm7, %v549_v58, %v548_v59 }
 0x4fe   :  { %551 = vst [vmem:[%s822_s8] sm:$0xff] %v550_v60 }

</bundles_post_ra>
